<compile_context>
chip_gen: v7x
topology: tpu7x:2x2x1
jax: 0.10.0
libtpu: 0.0.40
codegen_flags: <defaults>
</compile_context>

<pallas_src>
import jax
import jax.numpy as jnp
from jax import lax
from jax.experimental import pallas as pl
from jax.experimental.pallas import tpu as pltpu


def slide_classifier_kernel(x_ref, v1_ref, s1_ref, b1_ref, v2_ref, s2_ref, b2_ref,
                            o_ref, h_acc):
    """Grid = (M_tiles, K_tiles). K (axis 1) is the Linear-1 contraction axis."""
    k = pl.program_id(1)

    @pl.when(k == 0)
    def _init():
        h_acc[...] = jnp.zeros_like(h_acc)

    # Linear-1 partial product on the un-normalized weight: acc += x_tile @ V1^T_tile
    # (V1 is already transposed to (in, out) in the wrapper, so contract (1, 0)).
    h_acc[...] += lax.dot_general(
        x_ref[...], v1_ref[...], (((1,), (0,)), ((), ())),
        preferred_element_type=jnp.float32)

    @pl.when(k == pl.num_programs(1) - 1)
    def _finalize():
        # Fold the hoisted weight-norm scale into the (tm, H) activation, add bias, ReLU.
        h = jnp.maximum(s1_ref[0] * h_acc[...] + b1_ref[...], 0.0)
        # TODO(synk): nn.Dropout(hidden_dropout_prob) is identity in eval mode; no training path.

        # Linear 2 (H -> 3): tiny RHS, kept fully resident.
        logits = lax.dot_general(
            h.astype(v2_ref.dtype), v2_ref[...], (((1,), (0,)), ((), ())),
            preferred_element_type=jnp.float32)
        o_ref[...] = (s2_ref[0] * logits
                      + b2_ref[...].astype(jnp.float32)).astype(o_ref.dtype)


def slide_classifier(x, v1, g1, b1, v2, g2, b2):
    B, H = x.shape
    n_out = v2.shape[0]

    # --- hoisted weight-norm scalars: s = g / ||V||_F (x-independent, computed once) ---
    s1 = (g1.astype(jnp.float32).reshape(())
          * lax.rsqrt(jnp.sum(v1.astype(jnp.float32) ** 2))).reshape(1)
    s2 = (g2.astype(jnp.float32).reshape(())
          * lax.rsqrt(jnp.sum(v2.astype(jnp.float32) ** 2))).reshape(1)

    # --- pre-transposed (in, out) weights; keep caller dtype (bf16 stays bf16) ---
    v1_t = jnp.transpose(v1)                      # (H, H)   (in, out)
    v2_t = jnp.transpose(v2)                      # (H, 3)   (in, out)
    b1_2d = jnp.reshape(b1, (1, H))
    b2_2d = jnp.reshape(b2, (1, n_out))
    x = x.astype(v1.dtype)                        # matmuls accumulate in f32 regardless

    # --- tile sizes: full dims at small shapes, 128/512 tiles at production shapes ---
    tm = B if B <= 128 else (128 if B % 128 == 0 else B)
    tk = H if H <= 512 else (512 if H % 512 == 0 else H)
    grid = (B // tm, H // tk)

    smem = pl.BlockSpec(memory_space=pltpu.MemorySpace.SMEM)

    return pl.pallas_call(
        slide_classifier_kernel,
        out_shape=jax.ShapeDtypeStruct((B, n_out), x.dtype),
        grid=grid,
        in_specs=[
            pl.BlockSpec((tm, tk), lambda i, k: (i, k)),      # x tile
            pl.BlockSpec((tk, H), lambda i, k: (k, 0)),       # V1^T tile (streamed over K)
            smem,                                             # s1 = g1/||V1||  (1,) f32
            pl.BlockSpec((1, H), lambda i, k: (0, 0)),        # b1 (resident)
            pl.BlockSpec((H, n_out), lambda i, k: (0, 0)),    # V2^T (resident)
            smem,                                             # s2 = g2/||V2||  (1,) f32
            pl.BlockSpec((1, n_out), lambda i, k: (0, 0)),    # b2 (resident)
        ],
        out_specs=pl.BlockSpec((tm, n_out), lambda i, k: (i, 0)),
        scratch_shapes=[pltpu.VMEM((tm, H), jnp.float32)],    # Linear-1 f32 accumulator
        compiler_params=pltpu.CompilerParams(
            dimension_semantics=("parallel", "arbitrary")),
    )(x, v1_t, s1, b1_2d, v2_t, s2, b2_2d)


def slide_classifier_ref(x, v1, g1, b1, v2, g2, b2):
    w1 = g1 * v1 / jnp.sqrt(jnp.sum(v1 * v1))
    h = jnp.maximum(x @ w1.T + b1, 0.0)
    w2 = g2 * v2 / jnp.sqrt(jnp.sum(v2 * v2))
    return h @ w2.T + b2


if __name__ == "__main__":
    B, H, N_CLS = 8, 32, 3  # small shapes: batch=8, hidden=32, 3 sentiment classes

    key = jax.random.PRNGKey(0)
    k_x, k_v1, k_b1, k_v2, k_b2 = jax.random.split(key, 5)

    x = jax.random.normal(k_x, (B, H), dtype=jnp.float32)

    # weight_norm(dim=None) parametrization: V (raw weight), scalar g initialized to ||V||_F
    v1 = jax.random.normal(k_v1, (H, H), dtype=jnp.float32) * 0.1
    g1 = jnp.sqrt(jnp.sum(v1 * v1))
    b1 = jax.random.normal(k_b1, (H,), dtype=jnp.float32) * 0.05

    v2 = jax.random.normal(k_v2, (N_CLS, H), dtype=jnp.float32) * 0.1
    g2 = jnp.sqrt(jnp.sum(v2 * v2))
    b2 = jax.random.normal(k_b2, (N_CLS,), dtype=jnp.float32) * 0.05

    out = slide_classifier(x, v1, g1, b1, v2, g2, b2)
    out = jax.block_until_ready(out)

    ref = slide_classifier_ref(x, v1, g1, b1, v2, g2, b2)
    assert out.shape == (B, N_CLS)
    assert jnp.allclose(out, ref, atol=1e-4, rtol=1e-4), (out, ref)

    print("KERNEL_OK")
</pallas_src>

<mosaic_0001>
module attributes {stable_mosaic.version = 11 : i64} {
  func.func @slide_classifier_kernel(%arg0: i32, %arg1: i32, %arg2: memref<8x32xf32, #tpu.memory_space<vmem>>, %arg3: memref<32x32xf32, #tpu.memory_space<vmem>>, %arg4: memref<1xf32, #tpu.memory_space<smem>>, %arg5: memref<1x32xf32, #tpu.memory_space<vmem>>, %arg6: memref<32x3xf32, #tpu.memory_space<vmem>>, %arg7: memref<1xf32, #tpu.memory_space<smem>>, %arg8: memref<1x3xf32, #tpu.memory_space<vmem>>, %arg9: memref<8x3xf32, #tpu.memory_space<vmem>>, %arg10: memref<8x32xf32, #tpu.memory_space<vmem>>) attributes {dimension_semantics = [#tpu.dimension_semantics<parallel>, #tpu.dimension_semantics<arbitrary>], iteration_bounds = array<i64: 1, 1>, scalar_prefetch = 0 : i64, scratch_operands = 1 : i64, tpu.core_type = #tpu.core_type<tc>, window_params = [{transform_indices = @transform_0, window_bounds = array<i64: 8, 32>}, {transform_indices = @transform_1, window_bounds = array<i64: 32, 32>}, {transform_indices = @transform_2, window_bounds = array<i64: 1>}, {pipeline_mode = #tpu.pipeline_mode<synchronous>, transform_indices = @transform_3, window_bounds = array<i64: 1, 32>}, {pipeline_mode = #tpu.pipeline_mode<synchronous>, transform_indices = @transform_4, window_bounds = array<i64: 32, 3>}, {transform_indices = @transform_5, window_bounds = array<i64: 1>}, {pipeline_mode = #tpu.pipeline_mode<synchronous>, transform_indices = @transform_6, window_bounds = array<i64: 1, 3>}, {transform_indices = @transform_7, window_bounds = array<i64: 8, 3>}]} {
    %c0_i32 = arith.constant 0 : i32
    %0 = arith.cmpi eq, %arg1, %c0_i32 : i32
    %1 = arith.extui %0 : i1 to i32
    %c0_i32_0 = arith.constant 0 : i32
    %2 = arith.cmpi ne, %1, %c0_i32_0 : i32
    scf.if %2 {
      %cst_10 = arith.constant 0.000000e+00 : f32
      %12 = vector.broadcast %cst_10 : f32 to vector<8x32xf32>
      %c0_11 = arith.constant 0 : index
      %c0_12 = arith.constant 0 : index
      %13 = vector.load %arg10[%c0_11, %c0_12] : memref<8x32xf32, #tpu.memory_space<vmem>>, vector<8x32xf32>
      tpu.vector_store %arg10[%c0_11, %c0_12], %12 {strides = array<i32>} : memref<8x32xf32, #tpu.memory_space<vmem>>, vector<8x32xf32>,
    } else {
    }
    %c0 = arith.constant 0 : index
    %c0_1 = arith.constant 0 : index
    %3 = vector.load %arg10[%c0, %c0_1] : memref<8x32xf32, #tpu.memory_space<vmem>>, vector<8x32xf32>
    %c0_2 = arith.constant 0 : index
    %c0_3 = arith.constant 0 : index
    %4 = vector.load %arg2[%c0_2, %c0_3] : memref<8x32xf32, #tpu.memory_space<vmem>>, vector<8x32xf32>
    %c0_4 = arith.constant 0 : index
    %c0_5 = arith.constant 0 : index
    %5 = vector.load %arg3[%c0_4, %c0_5] : memref<32x32xf32, #tpu.memory_space<vmem>>, vector<32x32xf32>
    %cst = arith.constant dense<0.000000e+00> : vector<8x32xf32>
    %6 = tpu.matmul %4, %5, %cst {dimension_numbers = #tpu.dot_dimension_numbers<[1], [0], [0], [1], [0, 0, 1, 1], [], []>} : vector<8x32xf32>, vector<32x32xf32>, vector<8x32xf32> -> vector<8x32xf32>
    %7 = arith.addf %3, %6 : vector<8x32xf32>
    %c0_6 = arith.constant 0 : index
    %c0_7 = arith.constant 0 : index
    %8 = vector.load %arg10[%c0_6, %c0_7] : memref<8x32xf32, #tpu.memory_space<vmem>>, vector<8x32xf32>
    tpu.vector_store %arg10[%c0_6, %c0_7], %7 {strides = array<i32>} : memref<8x32xf32, #tpu.memory_space<vmem>>, vector<8x32xf32>,
    %c0_i32_8 = arith.constant 0 : i32
    %9 = arith.cmpi eq, %arg1, %c0_i32_8 : i32
    %10 = arith.extui %9 : i1 to i32
    %c0_i32_9 = arith.constant 0 : i32
    %11 = arith.cmpi ne, %10, %c0_i32_9 : i32
    scf.if %11 {
      %c0_10 = arith.constant 0 : index
      %12 = memref.load %arg4[%c0_10] : memref<1xf32, #tpu.memory_space<smem>>
      %c0_11 = arith.constant 0 : index
      %c0_12 = arith.constant 0 : index
      %13 = vector.load %arg10[%c0_11, %c0_12] : memref<8x32xf32, #tpu.memory_space<vmem>>, vector<8x32xf32>
      %14 = vector.broadcast %12 : f32 to vector<8x32xf32>
      %15 = arith.mulf %14, %13 : vector<8x32xf32>
      %c0_13 = arith.constant 0 : index
      %c0_14 = arith.constant 0 : index
      %16 = vector.load %arg5[%c0_13, %c0_14] : memref<1x32xf32, #tpu.memory_space<vmem>>, vector<1x32xf32>
      %17 = vector.broadcast %16 : vector<1x32xf32> to vector<8x32xf32>
      %18 = arith.addf %15, %17 : vector<8x32xf32>
      %cst_15 = arith.constant 0.000000e+00 : f32
      %19 = vector.broadcast %cst_15 : f32 to vector<8x32xf32>
      %20 = arith.maximumf %18, %19 : vector<8x32xf32>
      %c0_16 = arith.constant 0 : index
      %c0_17 = arith.constant 0 : index
      %21 = vector.load %arg6[%c0_16, %c0_17] : memref<32x3xf32, #tpu.memory_space<vmem>>, vector<32x3xf32>
      %cst_18 = arith.constant dense<0.000000e+00> : vector<8x3xf32>
      %22 = tpu.matmul %20, %21, %cst_18 {dimension_numbers = #tpu.dot_dimension_numbers<[1], [0], [0], [1], [0, 0, 1, 1], [], []>} : vector<8x32xf32>, vector<32x3xf32>, vector<8x3xf32> -> vector<8x3xf32>
      %c0_19 = arith.constant 0 : index
      %23 = memref.load %arg7[%c0_19] : memref<1xf32, #tpu.memory_space<smem>>
      %24 = vector.broadcast %23 : f32 to vector<8x3xf32>
      %25 = arith.mulf %24, %22 : vector<8x3xf32>
      %c0_20 = arith.constant 0 : index
      %c0_21 = arith.constant 0 : index
      %26 = vector.load %arg8[%c0_20, %c0_21] : memref<1x3xf32, #tpu.memory_space<vmem>>, vector<1x3xf32>
      %27 = vector.broadcast %26 : vector<1x3xf32> to vector<8x3xf32>
      %28 = arith.addf %25, %27 : vector<8x3xf32>
      %c0_22 = arith.constant 0 : index
      %c0_23 = arith.constant 0 : index
      %29 = vector.load %arg9[%c0_22, %c0_23] : memref<8x3xf32, #tpu.memory_space<vmem>>, vector<8x3xf32>
      tpu.vector_store %arg9[%c0_22, %c0_23], %28 {strides = array<i32>} : memref<8x3xf32, #tpu.memory_space<vmem>>, vector<8x3xf32>,
    } else {
    }
    return
  }
  func.func @transform_0(%arg0: i32, %arg1: i32) -> (i32, i32) {
    %c0_i32 = arith.constant 0 : i32
    return %arg0, %arg1 : i32, i32
  }
  func.func @transform_1(%arg0: i32, %arg1: i32) -> (i32, i32) {
    %c0_i32 = arith.constant 0 : i32
    %c0_i32_0 = arith.constant 0 : i32
    return %arg1, %c0_i32 : i32, i32
  }
  func.func @transform_2(%arg0: i32, %arg1: i32) -> i32 {
    %c0_i32 = arith.constant 0 : i32
    %c0_i32_0 = arith.constant 0 : i32
    return %c0_i32 : i32
  }
  func.func @transform_3(%arg0: i32, %arg1: i32) -> (i32, i32) {
    %c0_i32 = arith.constant 0 : i32
    %c0_i32_0 = arith.constant 0 : i32
    %c0_i32_1 = arith.constant 0 : i32
    return %c0_i32, %c0_i32_0 : i32, i32
  }
  func.func @transform_4(%arg0: i32, %arg1: i32) -> (i32, i32) {
    %c0_i32 = arith.constant 0 : i32
    %c0_i32_0 = arith.constant 0 : i32
    %c0_i32_1 = arith.constant 0 : i32
    return %c0_i32, %c0_i32_0 : i32, i32
  }
  func.func @transform_5(%arg0: i32, %arg1: i32) -> i32 {
    %c0_i32 = arith.constant 0 : i32
    %c0_i32_0 = arith.constant 0 : i32
    return %c0_i32 : i32
  }
  func.func @transform_6(%arg0: i32, %arg1: i32) -> (i32, i32) {
    %c0_i32 = arith.constant 0 : i32
    %c0_i32_0 = arith.constant 0 : i32
    %c0_i32_1 = arith.constant 0 : i32
    return %c0_i32, %c0_i32_0 : i32, i32
  }
  func.func @transform_7(%arg0: i32, %arg1: i32) -> (i32, i32) {
    %c0_i32 = arith.constant 0 : i32
    %c0_i32_0 = arith.constant 0 : i32
    return %arg0, %c0_i32 : i32, i32
  }
}

</mosaic_0001>

<bundles_post_ra>
// kernel: tpu_custom_call.1
= control target key start
LH: loop header
LB: loop body
LE: loop exit
PB: predicated region body
PF: predicated region fallthrough
CT: control target
= control target key end

     0   :  { %vm32_vm0 = vcmask 261120   ;;  %v277_v0 = vmov 0.0|0.0   ;;  %vm278_vm1 = vmmov 0   ;;  %v279_v4 = vmov 0.0   ;;  %s366_s1 = inlined_call_operand.vmem [shape: f32[32,32], index: 1, kind: input, shape index: {}]   ;;  %s367_s0 = inlined_call_operand.vmem [shape: f32[8,32], index: 0, kind: input, shape index: {}]   ;;  %s368_s4 = inlined_call_operand.vmem [shape: f32[32,3], index: 4, kind: input, shape index: {}]   ;;  %s369_s2 = inlined_call_operand.<no memory space> [shape: f32[1], index: 2, kind: input, shape index: {}]   ;;  %s370_s3 = inlined_call_operand.vmem [shape: f32[1,32], index: 3, kind: input, shape index: {}]   ;;  %s371_s5 = inlined_call_operand.<no memory space> [shape: f32[1], index: 5, kind: input, shape index: {}]   ;;  %s372_s6 = inlined_call_operand.vmem [shape: f32[1,3], index: 6, kind: input, shape index: {}]   ;;  %s373_s7 = inlined_call_operand.vmem [shape: f32[8,3], index: 7, kind: output, shape index: {}]  }
   0x1   :  { %262 = vmatprep.subr.bf16.mxu0 %v277_v0  ;;  %v36_v1 = vld [vmem:[%s366_s1] sm:$0xff]  ;;  %v37_v2 = vld [vmem:[%s366_s1 + $0x8] sm:$0xff]  ;;  %v38_v3 = vld [vmem:[%s366_s1 + $0x10] sm:$0xff]  ;;  %248 = vmatprep.mubr.msk.f32.mxu0 %vm278_vm1, %v279_v4  ;;  %33 = vst.msk [vmem:[#allocation2] sm:$0xff] %vm32_vm0, %v279_v4  ;;  %v121_v19 = vstv %s369_s2  ;;  %vm220_vm2 = vcmask 23552  }
   0x2   :  { %v263_v5 = vpack.c.bf16 %v37_v2, %v36_v1  ;;  %v39_v6 = vld [vmem:[%s366_s1 + $0x18] sm:$0xff]  ;;  %268 = vmatprep.subr.bf16.mxu1 %v277_v0  ;;  %259 = vmatprep.mubr.msk.f32.mxu1 %vm278_vm1, %v279_v4  ;;  %v35_v8 = vld [vmem:[%s367_s0] sm:$0xff]  ;;  %v133_v10 = vld [vmem:[%s368_s4 + $0x8] sm:$0xff]  ;;  %v210_v25 = vstv %s371_s5 }
   0x3   :  { %v266_v7 = vpack.c.bf16 %v39_v6, %v38_v3  ;;  %v132_v9 = vld [vmem:[%s368_s4] sm:$0xff]  ;;  %v134_v11 = vld [vmem:[%s368_s4 + $0x10] sm:$0xff]  ;;  %v135_v13 = vld [vmem:[%s368_s4 + $0x18] sm:$0xff] }
   0x4   :  { %264 = vmatpush3.bf16.msra.mxu0 %v263_v5  ;;  %v269_v12 = vpack.c.bf16 %v133_v10, %v132_v9  ;;  %v272_v14 = vpack.c.bf16 %v135_v13, %v134_v11  ;;  %v227_v21 = vld [vmem:[%s370_s3] ss:$0 sm:$0xff] }
   0x5   :  { %265 = vmatprep.subr.bf16.mxu0 %v277_v0  ;;  %v229_v27 = vld [vmem:[%s372_s6] ss:$0 sm:$0xff] }
   0x6   :  { %270 = vmatpush3.bf16.msra.mxu1 %v269_v12 }
   0x7   :  { %271 = vmatprep.subr.bf16.mxu1 %v277_v0 }
   0x8   :  { %267 = vmatpush3.bf16.msra.mxu0 %v266_v7  ;;  %v34_v15 = vld [vmem:[#allocation2] sm:$0xff] }
   0xa   :  { %273 = vmatpush3.bf16.msra.mxu1 %v272_v14 }
   0xb   :  { %249 = vmatmul.mubr.msk.f32.vlgmr.msra.gmra.mrb[0].mxu0 %vm32_vm0, %v35_v8 }
  0xde   :  { %v110_v16 = vpop.f32.mrb[0].mxu0 }
  0xdf   :  { %v114_v17 = vadd.f32 %v110_v16, %v34_v15  ;;  %v250_v18 = vpop.f32.mrb[1].mxu0 }
  0xe1   :  { %115 = vst.msk [vmem:[#allocation2] sm:$0xff] %vm32_vm0, %v114_v17 }
  0xe8   :  { %v120_v20 = vld [vmem:[#allocation2] sm:$0xff] }
  0xe9   :  { %v122_v22 = vmul.f32 %v121_v19, %v120_v20 }
  0xeb   :  { %v130_v23 = vadd.f32 %v227_v21, %v122_v22 }
  0xed   :  { %v131_v24 = vmax.f32 %v130_v23, 0.0 }
  0xef   :  { %260 = vmatmul.mubr.msk.f32.vlgmr.msra.gmra.mrb[0].mxu1 %vm32_vm0, %v131_v24 }
 0x1c2   :  { %v205_v26 = vpop.f32.mrb[0].mxu1 }
 0x1c3   :  { %v211_v28 = vmul.f32 %v210_v25, %v205_v26  ;;  %v261_v29 = vpop.f32.mrb[1].mxu1 }
 0x1c5   :  { %v219_v30 = vadd.f32 %v229_v27, %v211_v28 }
 0x1c7   :  { %221 = vst.msk [vmem:[%s373_s7] sm:$0xff] %vm220_vm2, %v219_v30 }

</bundles_post_ra>
